<compile_context>
chip_gen: v5e
topology: v5e:2x2
jax: 0.10.0
libtpu: 0.0.40
codegen_flags: <defaults>
</compile_context>

<pallas_src>
import functools

import jax
import jax.numpy as jnp
from jax import lax
from jax.experimental import pallas as pl
from jax.experimental.pallas import tpu as pltpu


def rir_kernel(x_ref, w1_ref, w2_ref, mask_ref, o_ref, *, H, W):
    """One image per grid step; activations are (C, H*W), lane axis = H*W."""
    C, HW = x_ref.shape[1], x_ref.shape[2]
    x = x_ref[0]                                        # (C, HW) f32

    # Load the 9 tap-validity masks once; reused by both convs.
    masks = [mask_ref[t] for t in range(9)]             # each (1, HW) f32

    def conv3x3(a, w_ref):
        # 3x3 / stride-1 / pad-1 conv: 9 lane-rolled taps, each a
        # (C_out, C_in) x (C_in, HW) MXU matmul accumulated in f32.
        acc = None
        tap = 0
        for dh in (-1, 0, 1):
            for dw in (-1, 0, 1):
                d = dh * W + dw                          # flat tap offset
                if d == 0:
                    t = a
                else:
                    # t[:, p] = a[:, p + d] (wrapped) -> XLU roll, no VMEM copies.
                    t = pltpu.roll(a, (-d) % HW, 1)
                    t = t * masks[tap]                   # zero out-of-image taps
                contrib = jnp.dot(w_ref[tap], t,
                                  preferred_element_type=jnp.float32)
                acc = contrib if acc is None else acc + contrib
                tap += 1
        return acc

    h1 = jnp.maximum(conv3x3(x, w1_ref), 0.0)            # conv1 + ReLU
    h2 = conv3x3(h1, w2_ref)                             # conv2
    o_ref[0] = (h2 + x).astype(o_ref.dtype)              # residual add


def _tap_masks(H, W):
    """(9, 1, H*W) f32 validity masks for the 9 conv taps (built host-side once;
    avoids in-kernel iota/div and any zero-padded scratch)."""
    h = jnp.arange(H)[:, None]
    w = jnp.arange(W)[None, :]
    masks = []
    for dh in (-1, 0, 1):
        for dw in (-1, 0, 1):
            valid = ((h + dh >= 0) & (h + dh < H) &
                     (w + dw >= 0) & (w + dw < W))
            masks.append(valid.reshape(1, H * W))
    return jnp.stack(masks, 0).astype(jnp.float32)


def rir_forward(x_nchw, w1_oihw, w2_oihw, w3_oihw=None):
    """x: (N, C, H, W) NCHW; weights: (C, C, 3, 3) OIHW (PyTorch conventions).

    Returns conv2(relu(conv1(x))) + x — exactly the tensor the reference
    forward returns.  w3 belongs to the dead sigmoid-gate branch and is unused.
    """
    del w3_oihw  # dead gate branch (does not affect the module's return value)
    N, C, H, W = x_nchw.shape
    HW = H * W

    # NCHW -> (N, C, H*W): pure reshape, no transpose passes; H*W is lane-dense.
    x = x_nchw.reshape(N, C, HW).astype(jnp.float32)
    # OIHW -> (tap, C_out, C_in), tap = (dh+1)*3 + (dw+1) matching the kernel loop.
    to_taps = lambda w: jnp.transpose(w, (2, 3, 0, 1)).astype(jnp.float32).reshape(9, C, C)
    w1, w2 = to_taps(w1_oihw), to_taps(w2_oihw)
    masks = _tap_masks(H, W)

    cost = pl.CostEstimate(
        flops=N * 2 * (2 * HW * C * C * 9),              # 2 convs x 9 taps
        transcendentals=0,
        bytes_accessed=(2 * N * C * HW + 2 * 9 * C * C + 9 * HW) * 4)

    out = pl.pallas_call(
        functools.partial(rir_kernel, H=H, W=W),
        out_shape=jax.ShapeDtypeStruct((N, C, HW), jnp.float32),
        grid_spec=pltpu.PrefetchScalarGridSpec(
            num_scalar_prefetch=0,
            grid=(N,),                                    # one image per step
            in_specs=[
                pl.BlockSpec((1, C, HW), lambda n: (n, 0, 0)),
                pl.BlockSpec((9, C, C), lambda n: (0, 0, 0)),    # resident weights
                pl.BlockSpec((9, C, C), lambda n: (0, 0, 0)),    # resident weights
                pl.BlockSpec((9, 1, HW), lambda n: (0, 0, 0)),   # resident masks
            ],
            out_specs=pl.BlockSpec((1, C, HW), lambda n: (n, 0, 0)),
        ),
        compiler_params=pltpu.CompilerParams(
            dimension_semantics=("parallel",)),
        cost_estimate=cost,
    )(x, w1, w2, masks)

    return out.reshape(N, C, H, W)


def rir_reference(x_nchw, w1, w2):
    """Plain-JAX (HIGHEST precision) reference of the returned tensor."""
    dn = lax.conv_dimension_numbers(x_nchw.shape, w1.shape,
                                    ('NCHW', 'OIHW', 'NCHW'))
    conv = lambda x, w: lax.conv_general_dilated(
        x, w, window_strides=(1, 1), padding=((1, 1), (1, 1)),
        dimension_numbers=dn, precision=lax.Precision.HIGHEST)
    out = jax.nn.relu(conv(x_nchw, w1))
    return conv(out, w2) + x_nchw


if __name__ == "__main__":
    N, dim, H, W = 2, 4, 16, 16

    key = jax.random.PRNGKey(0)
    kx, k1, k2, k3 = jax.random.split(key, 4)
    x = jax.random.normal(kx, (N, dim, H, W), dtype=jnp.float32)
    fan_in = dim * 3 * 3
    scale = (2.0 / fan_in) ** 0.5
    w1 = scale * jax.random.normal(k1, (dim, dim, 3, 3), dtype=jnp.float32)
    w2 = scale * jax.random.normal(k2, (dim, dim, 3, 3), dtype=jnp.float32)
    w3 = scale * jax.random.normal(k3, (dim, dim, 3, 3), dtype=jnp.float32)  # dead branch

    out = jax.block_until_ready(rir_forward(x, w1, w2, w3))

    ref = rir_reference(x, w1, w2)
    assert out.shape == (N, dim, H, W)
    # Kernel uses default MXU precision (perf review); reference is HIGHEST,
    # so the comparison tolerance is loosened accordingly.
    err = float(jnp.max(jnp.abs(out - ref)))
    assert jnp.allclose(out, ref, atol=5e-2, rtol=5e-2), f"max abs diff {err}"

    print("KERNEL_OK")
</pallas_src>

<mosaic_0001>
module attributes {stable_mosaic.version = 11 : i64} {
  func.func @rir_kernel(%arg0: i32, %arg1: memref<1x4x256xf32, #tpu.memory_space<vmem>>, %arg2: memref<9x4x4xf32, #tpu.memory_space<vmem>>, %arg3: memref<9x4x4xf32, #tpu.memory_space<vmem>>, %arg4: memref<9x1x256xf32, #tpu.memory_space<vmem>>, %arg5: memref<1x4x256xf32, #tpu.memory_space<vmem>>) attributes {dimension_semantics = [#tpu.dimension_semantics<parallel>], iteration_bounds = array<i64: 2>, scalar_prefetch = 0 : i64, scratch_operands = 0 : i64, tpu.core_type = #tpu.core_type<tc>, window_params = [{transform_indices = @transform_0, window_bounds = array<i64: 1, 4, 256>}, {pipeline_mode = #tpu.pipeline_mode<synchronous>, transform_indices = @transform_1, window_bounds = array<i64: 9, 4, 4>}, {pipeline_mode = #tpu.pipeline_mode<synchronous>, transform_indices = @transform_2, window_bounds = array<i64: 9, 4, 4>}, {pipeline_mode = #tpu.pipeline_mode<synchronous>, transform_indices = @transform_3, window_bounds = array<i64: 9, 1, 256>}, {transform_indices = @transform_4, window_bounds = array<i64: 1, 4, 256>}]} {
    %c0 = arith.constant 0 : index
    %c0_0 = arith.constant 0 : index
    %c0_1 = arith.constant 0 : index
    %0 = vector.load %arg1[%c0, %c0_0, %c0_1] : memref<1x4x256xf32, #tpu.memory_space<vmem>>, vector<1x4x256xf32>
    %1 = vector.shape_cast %0 : vector<1x4x256xf32> to vector<4x256xf32>
    %c0_2 = arith.constant 0 : index
    %c0_3 = arith.constant 0 : index
    %c0_4 = arith.constant 0 : index
    %2 = vector.load %arg4[%c0_2, %c0_3, %c0_4] : memref<9x1x256xf32, #tpu.memory_space<vmem>>, vector<1x1x256xf32>
    %3 = vector.shape_cast %2 : vector<1x1x256xf32> to vector<1x256xf32>
    %c1 = arith.constant 1 : index
    %c0_5 = arith.constant 0 : index
    %c0_6 = arith.constant 0 : index
    %4 = vector.load %arg4[%c1, %c0_5, %c0_6] : memref<9x1x256xf32, #tpu.memory_space<vmem>>, vector<1x1x256xf32>
    %5 = vector.shape_cast %4 : vector<1x1x256xf32> to vector<1x256xf32>
    %c2 = arith.constant 2 : index
    %c0_7 = arith.constant 0 : index
    %c0_8 = arith.constant 0 : index
    %6 = vector.load %arg4[%c2, %c0_7, %c0_8] : memref<9x1x256xf32, #tpu.memory_space<vmem>>, vector<1x1x256xf32>
    %7 = vector.shape_cast %6 : vector<1x1x256xf32> to vector<1x256xf32>
    %c3 = arith.constant 3 : index
    %c0_9 = arith.constant 0 : index
    %c0_10 = arith.constant 0 : index
    %8 = vector.load %arg4[%c3, %c0_9, %c0_10] : memref<9x1x256xf32, #tpu.memory_space<vmem>>, vector<1x1x256xf32>
    %9 = vector.shape_cast %8 : vector<1x1x256xf32> to vector<1x256xf32>
    %c5 = arith.constant 5 : index
    %c0_11 = arith.constant 0 : index
    %c0_12 = arith.constant 0 : index
    %10 = vector.load %arg4[%c5, %c0_11, %c0_12] : memref<9x1x256xf32, #tpu.memory_space<vmem>>, vector<1x1x256xf32>
    %11 = vector.shape_cast %10 : vector<1x1x256xf32> to vector<1x256xf32>
    %c6 = arith.constant 6 : index
    %c0_13 = arith.constant 0 : index
    %c0_14 = arith.constant 0 : index
    %12 = vector.load %arg4[%c6, %c0_13, %c0_14] : memref<9x1x256xf32, #tpu.memory_space<vmem>>, vector<1x1x256xf32>
    %13 = vector.shape_cast %12 : vector<1x1x256xf32> to vector<1x256xf32>
    %c7 = arith.constant 7 : index
    %c0_15 = arith.constant 0 : index
    %c0_16 = arith.constant 0 : index
    %14 = vector.load %arg4[%c7, %c0_15, %c0_16] : memref<9x1x256xf32, #tpu.memory_space<vmem>>, vector<1x1x256xf32>
    %15 = vector.shape_cast %14 : vector<1x1x256xf32> to vector<1x256xf32>
    %c8 = arith.constant 8 : index
    %c0_17 = arith.constant 0 : index
    %c0_18 = arith.constant 0 : index
    %16 = vector.load %arg4[%c8, %c0_17, %c0_18] : memref<9x1x256xf32, #tpu.memory_space<vmem>>, vector<1x1x256xf32>
    %17 = vector.shape_cast %16 : vector<1x1x256xf32> to vector<1x256xf32>
    %c17_i32 = arith.constant 17 : i32
    %18 = tpu.dynamic_rotate %1 by %c17_i32 dim 1 : vector<4x256xf32>, i32 -> vector<4x256xf32>
    %19 = vector.broadcast %3 : vector<1x256xf32> to vector<4x256xf32>
    %20 = arith.mulf %18, %19 : vector<4x256xf32>
    %c0_19 = arith.constant 0 : index
    %c0_20 = arith.constant 0 : index
    %c0_21 = arith.constant 0 : index
    %21 = vector.load %arg2[%c0_19, %c0_20, %c0_21] : memref<9x4x4xf32, #tpu.memory_space<vmem>>, vector<1x4x4xf32>
    %22 = vector.shape_cast %21 : vector<1x4x4xf32> to vector<4x4xf32>
    %cst = arith.constant dense<0.000000e+00> : vector<4x256xf32>
    %23 = tpu.matmul %22, %20, %cst {dimension_numbers = #tpu.dot_dimension_numbers<[1], [0], [0], [1], [0, 0, 1, 1], [], []>} : vector<4x4xf32>, vector<4x256xf32>, vector<4x256xf32> -> vector<4x256xf32>
    %c16_i32 = arith.constant 16 : i32
    %24 = tpu.dynamic_rotate %1 by %c16_i32 dim 1 : vector<4x256xf32>, i32 -> vector<4x256xf32>
    %25 = vector.broadcast %5 : vector<1x256xf32> to vector<4x256xf32>
    %26 = arith.mulf %24, %25 : vector<4x256xf32>
    %c1_22 = arith.constant 1 : index
    %c0_23 = arith.constant 0 : index
    %c0_24 = arith.constant 0 : index
    %27 = vector.load %arg2[%c1_22, %c0_23, %c0_24] : memref<9x4x4xf32, #tpu.memory_space<vmem>>, vector<1x4x4xf32>
    %28 = vector.shape_cast %27 : vector<1x4x4xf32> to vector<4x4xf32>
    %cst_25 = arith.constant dense<0.000000e+00> : vector<4x256xf32>
    %29 = tpu.matmul %28, %26, %cst_25 {dimension_numbers = #tpu.dot_dimension_numbers<[1], [0], [0], [1], [0, 0, 1, 1], [], []>} : vector<4x4xf32>, vector<4x256xf32>, vector<4x256xf32> -> vector<4x256xf32>
    %30 = arith.addf %23, %29 : vector<4x256xf32>
    %c15_i32 = arith.constant 15 : i32
    %31 = tpu.dynamic_rotate %1 by %c15_i32 dim 1 : vector<4x256xf32>, i32 -> vector<4x256xf32>
    %32 = vector.broadcast %7 : vector<1x256xf32> to vector<4x256xf32>
    %33 = arith.mulf %31, %32 : vector<4x256xf32>
    %c2_26 = arith.constant 2 : index
    %c0_27 = arith.constant 0 : index
    %c0_28 = arith.constant 0 : index
    %34 = vector.load %arg2[%c2_26, %c0_27, %c0_28] : memref<9x4x4xf32, #tpu.memory_space<vmem>>, vector<1x4x4xf32>
    %35 = vector.shape_cast %34 : vector<1x4x4xf32> to vector<4x4xf32>
    %cst_29 = arith.constant dense<0.000000e+00> : vector<4x256xf32>
    %36 = tpu.matmul %35, %33, %cst_29 {dimension_numbers = #tpu.dot_dimension_numbers<[1], [0], [0], [1], [0, 0, 1, 1], [], []>} : vector<4x4xf32>, vector<4x256xf32>, vector<4x256xf32> -> vector<4x256xf32>
    %37 = arith.addf %30, %36 : vector<4x256xf32>
    %c1_i32 = arith.constant 1 : i32
    %38 = tpu.dynamic_rotate %1 by %c1_i32 dim 1 : vector<4x256xf32>, i32 -> vector<4x256xf32>
    %39 = vector.broadcast %9 : vector<1x256xf32> to vector<4x256xf32>
    %40 = arith.mulf %38, %39 : vector<4x256xf32>
    %c3_30 = arith.constant 3 : index
    %c0_31 = arith.constant 0 : index
    %c0_32 = arith.constant 0 : index
    %41 = vector.load %arg2[%c3_30, %c0_31, %c0_32] : memref<9x4x4xf32, #tpu.memory_space<vmem>>, vector<1x4x4xf32>
    %42 = vector.shape_cast %41 : vector<1x4x4xf32> to vector<4x4xf32>
    %cst_33 = arith.constant dense<0.000000e+00> : vector<4x256xf32>
    %43 = tpu.matmul %42, %40, %cst_33 {dimension_numbers = #tpu.dot_dimension_numbers<[1], [0], [0], [1], [0, 0, 1, 1], [], []>} : vector<4x4xf32>, vector<4x256xf32>, vector<4x256xf32> -> vector<4x256xf32>
    %44 = arith.addf %37, %43 : vector<4x256xf32>
    %c4 = arith.constant 4 : index
    %c0_34 = arith.constant 0 : index
    %c0_35 = arith.constant 0 : index
    %45 = vector.load %arg2[%c4, %c0_34, %c0_35] : memref<9x4x4xf32, #tpu.memory_space<vmem>>, vector<1x4x4xf32>
    %46 = vector.shape_cast %45 : vector<1x4x4xf32> to vector<4x4xf32>
    %cst_36 = arith.constant dense<0.000000e+00> : vector<4x256xf32>
    %47 = tpu.matmul %46, %1, %cst_36 {dimension_numbers = #tpu.dot_dimension_numbers<[1], [0], [0], [1], [0, 0, 1, 1], [], []>} : vector<4x4xf32>, vector<4x256xf32>, vector<4x256xf32> -> vector<4x256xf32>
    %48 = arith.addf %44, %47 : vector<4x256xf32>
    %c255_i32 = arith.constant 255 : i32
    %49 = tpu.dynamic_rotate %1 by %c255_i32 dim 1 : vector<4x256xf32>, i32 -> vector<4x256xf32>
    %50 = vector.broadcast %11 : vector<1x256xf32> to vector<4x256xf32>
    %51 = arith.mulf %49, %50 : vector<4x256xf32>
    %c5_37 = arith.constant 5 : index
    %c0_38 = arith.constant 0 : index
    %c0_39 = arith.constant 0 : index
    %52 = vector.load %arg2[%c5_37, %c0_38, %c0_39] : memref<9x4x4xf32, #tpu.memory_space<vmem>>, vector<1x4x4xf32>
    %53 = vector.shape_cast %52 : vector<1x4x4xf32> to vector<4x4xf32>
    %cst_40 = arith.constant dense<0.000000e+00> : vector<4x256xf32>
    %54 = tpu.matmul %53, %51, %cst_40 {dimension_numbers = #tpu.dot_dimension_numbers<[1], [0], [0], [1], [0, 0, 1, 1], [], []>} : vector<4x4xf32>, vector<4x256xf32>, vector<4x256xf32> -> vector<4x256xf32>
    %55 = arith.addf %48, %54 : vector<4x256xf32>
    %c241_i32 = arith.constant 241 : i32
    %56 = tpu.dynamic_rotate %1 by %c241_i32 dim 1 : vector<4x256xf32>, i32 -> vector<4x256xf32>
    %57 = vector.broadcast %13 : vector<1x256xf32> to vector<4x256xf32>
    %58 = arith.mulf %56, %57 : vector<4x256xf32>
    %c6_41 = arith.constant 6 : index
    %c0_42 = arith.constant 0 : index
    %c0_43 = arith.constant 0 : index
    %59 = vector.load %arg2[%c6_41, %c0_42, %c0_43] : memref<9x4x4xf32, #tpu.memory_space<vmem>>, vector<1x4x4xf32>
    %60 = vector.shape_cast %59 : vector<1x4x4xf32> to vector<4x4xf32>
    %cst_44 = arith.constant dense<0.000000e+00> : vector<4x256xf32>
    %61 = tpu.matmul %60, %58, %cst_44 {dimension_numbers = #tpu.dot_dimension_numbers<[1], [0], [0], [1], [0, 0, 1, 1], [], []>} : vector<4x4xf32>, vector<4x256xf32>, vector<4x256xf32> -> vector<4x256xf32>
    %62 = arith.addf %55, %61 : vector<4x256xf32>
    %c240_i32 = arith.constant 240 : i32
    %63 = tpu.dynamic_rotate %1 by %c240_i32 dim 1 : vector<4x256xf32>, i32 -> vector<4x256xf32>
    %64 = vector.broadcast %15 : vector<1x256xf32> to vector<4x256xf32>
    %65 = arith.mulf %63, %64 : vector<4x256xf32>
    %c7_45 = arith.constant 7 : index
    %c0_46 = arith.constant 0 : index
    %c0_47 = arith.constant 0 : index
    %66 = vector.load %arg2[%c7_45, %c0_46, %c0_47] : memref<9x4x4xf32, #tpu.memory_space<vmem>>, vector<1x4x4xf32>
    %67 = vector.shape_cast %66 : vector<1x4x4xf32> to vector<4x4xf32>
    %cst_48 = arith.constant dense<0.000000e+00> : vector<4x256xf32>
    %68 = tpu.matmul %67, %65, %cst_48 {dimension_numbers = #tpu.dot_dimension_numbers<[1], [0], [0], [1], [0, 0, 1, 1], [], []>} : vector<4x4xf32>, vector<4x256xf32>, vector<4x256xf32> -> vector<4x256xf32>
    %69 = arith.addf %62, %68 : vector<4x256xf32>
    %c239_i32 = arith.constant 239 : i32
    %70 = tpu.dynamic_rotate %1 by %c239_i32 dim 1 : vector<4x256xf32>, i32 -> vector<4x256xf32>
    %71 = vector.broadcast %17 : vector<1x256xf32> to vector<4x256xf32>
    %72 = arith.mulf %70, %71 : vector<4x256xf32>
    %c8_49 = arith.constant 8 : index
    %c0_50 = arith.constant 0 : index
    %c0_51 = arith.constant 0 : index
    %73 = vector.load %arg2[%c8_49, %c0_50, %c0_51] : memref<9x4x4xf32, #tpu.memory_space<vmem>>, vector<1x4x4xf32>
    %74 = vector.shape_cast %73 : vector<1x4x4xf32> to vector<4x4xf32>
    %cst_52 = arith.constant dense<0.000000e+00> : vector<4x256xf32>
    %75 = tpu.matmul %74, %72, %cst_52 {dimension_numbers = #tpu.dot_dimension_numbers<[1], [0], [0], [1], [0, 0, 1, 1], [], []>} : vector<4x4xf32>, vector<4x256xf32>, vector<4x256xf32> -> vector<4x256xf32>
    %76 = arith.addf %69, %75 : vector<4x256xf32>
    %cst_53 = arith.constant 0.000000e+00 : f32
    %77 = vector.broadcast %cst_53 : f32 to vector<4x256xf32>
    %78 = arith.maximumf %76, %77 : vector<4x256xf32>
    %c17_i32_54 = arith.constant 17 : i32
    %79 = tpu.dynamic_rotate %78 by %c17_i32_54 dim 1 : vector<4x256xf32>, i32 -> vector<4x256xf32>
    %80 = vector.broadcast %3 : vector<1x256xf32> to vector<4x256xf32>
    %81 = arith.mulf %79, %80 : vector<4x256xf32>
    %c0_55 = arith.constant 0 : index
    %c0_56 = arith.constant 0 : index
    %c0_57 = arith.constant 0 : index
    %82 = vector.load %arg3[%c0_55, %c0_56, %c0_57] : memref<9x4x4xf32, #tpu.memory_space<vmem>>, vector<1x4x4xf32>
    %83 = vector.shape_cast %82 : vector<1x4x4xf32> to vector<4x4xf32>
    %cst_58 = arith.constant dense<0.000000e+00> : vector<4x256xf32>
    %84 = tpu.matmul %83, %81, %cst_58 {dimension_numbers = #tpu.dot_dimension_numbers<[1], [0], [0], [1], [0, 0, 1, 1], [], []>} : vector<4x4xf32>, vector<4x256xf32>, vector<4x256xf32> -> vector<4x256xf32>
    %c16_i32_59 = arith.constant 16 : i32
    %85 = tpu.dynamic_rotate %78 by %c16_i32_59 dim 1 : vector<4x256xf32>, i32 -> vector<4x256xf32>
    %86 = vector.broadcast %5 : vector<1x256xf32> to vector<4x256xf32>
    %87 = arith.mulf %85, %86 : vector<4x256xf32>
    %c1_60 = arith.constant 1 : index
    %c0_61 = arith.constant 0 : index
    %c0_62 = arith.constant 0 : index
    %88 = vector.load %arg3[%c1_60, %c0_61, %c0_62] : memref<9x4x4xf32, #tpu.memory_space<vmem>>, vector<1x4x4xf32>
    %89 = vector.shape_cast %88 : vector<1x4x4xf32> to vector<4x4xf32>
    %cst_63 = arith.constant dense<0.000000e+00> : vector<4x256xf32>
    %90 = tpu.matmul %89, %87, %cst_63 {dimension_numbers = #tpu.dot_dimension_numbers<[1], [0], [0], [1], [0, 0, 1, 1], [], []>} : vector<4x4xf32>, vector<4x256xf32>, vector<4x256xf32> -> vector<4x256xf32>
    %91 = arith.addf %84, %90 : vector<4x256xf32>
    %c15_i32_64 = arith.constant 15 : i32
    %92 = tpu.dynamic_rotate %78 by %c15_i32_64 dim 1 : vector<4x256xf32>, i32 -> vector<4x256xf32>
    %93 = vector.broadcast %7 : vector<1x256xf32> to vector<4x256xf32>
    %94 = arith.mulf %92, %93 : vector<4x256xf32>
    %c2_65 = arith.constant 2 : index
    %c0_66 = arith.constant 0 : index
    %c0_67 = arith.constant 0 : index
    %95 = vector.load %arg3[%c2_65, %c0_66, %c0_67] : memref<9x4x4xf32, #tpu.memory_space<vmem>>, vector<1x4x4xf32>
    %96 = vector.shape_cast %95 : vector<1x4x4xf32> to vector<4x4xf32>
    %cst_68 = arith.constant dense<0.000000e+00> : vector<4x256xf32>
    %97 = tpu.matmul %96, %94, %cst_68 {dimension_numbers = #tpu.dot_dimension_numbers<[1], [0], [0], [1], [0, 0, 1, 1], [], []>} : vector<4x4xf32>, vector<4x256xf32>, vector<4x256xf32> -> vector<4x256xf32>
    %98 = arith.addf %91, %97 : vector<4x256xf32>
    %c1_i32_69 = arith.constant 1 : i32
    %99 = tpu.dynamic_rotate %78 by %c1_i32_69 dim 1 : vector<4x256xf32>, i32 -> vector<4x256xf32>
    %100 = vector.broadcast %9 : vector<1x256xf32> to vector<4x256xf32>
    %101 = arith.mulf %99, %100 : vector<4x256xf32>
    %c3_70 = arith.constant 3 : index
    %c0_71 = arith.constant 0 : index
    %c0_72 = arith.constant 0 : index
    %102 = vector.load %arg3[%c3_70, %c0_71, %c0_72] : memref<9x4x4xf32, #tpu.memory_space<vmem>>, vector<1x4x4xf32>
    %103 = vector.shape_cast %102 : vector<1x4x4xf32> to vector<4x4xf32>
    %cst_73 = arith.constant dense<0.000000e+00> : vector<4x256xf32>
    %104 = tpu.matmul %103, %101, %cst_73 {dimension_numbers = #tpu.dot_dimension_numbers<[1], [0], [0], [1], [0, 0, 1, 1], [], []>} : vector<4x4xf32>, vector<4x256xf32>, vector<4x256xf32> -> vector<4x256xf32>
    %105 = arith.addf %98, %104 : vector<4x256xf32>
    %c4_74 = arith.constant 4 : index
    %c0_75 = arith.constant 0 : index
    %c0_76 = arith.constant 0 : index
    %106 = vector.load %arg3[%c4_74, %c0_75, %c0_76] : memref<9x4x4xf32, #tpu.memory_space<vmem>>, vector<1x4x4xf32>
    %107 = vector.shape_cast %106 : vector<1x4x4xf32> to vector<4x4xf32>
    %cst_77 = arith.constant dense<0.000000e+00> : vector<4x256xf32>
    %108 = tpu.matmul %107, %78, %cst_77 {dimension_numbers = #tpu.dot_dimension_numbers<[1], [0], [0], [1], [0, 0, 1, 1], [], []>} : vector<4x4xf32>, vector<4x256xf32>, vector<4x256xf32> -> vector<4x256xf32>
    %109 = arith.addf %105, %108 : vector<4x256xf32>
    %c255_i32_78 = arith.constant 255 : i32
    %110 = tpu.dynamic_rotate %78 by %c255_i32_78 dim 1 : vector<4x256xf32>, i32 -> vector<4x256xf32>
    %111 = vector.broadcast %11 : vector<1x256xf32> to vector<4x256xf32>
    %112 = arith.mulf %110, %111 : vector<4x256xf32>
    %c5_79 = arith.constant 5 : index
    %c0_80 = arith.constant 0 : index
    %c0_81 = arith.constant 0 : index
    %113 = vector.load %arg3[%c5_79, %c0_80, %c0_81] : memref<9x4x4xf32, #tpu.memory_space<vmem>>, vector<1x4x4xf32>
    %114 = vector.shape_cast %113 : vector<1x4x4xf32> to vector<4x4xf32>
    %cst_82 = arith.constant dense<0.000000e+00> : vector<4x256xf32>
    %115 = tpu.matmul %114, %112, %cst_82 {dimension_numbers = #tpu.dot_dimension_numbers<[1], [0], [0], [1], [0, 0, 1, 1], [], []>} : vector<4x4xf32>, vector<4x256xf32>, vector<4x256xf32> -> vector<4x256xf32>
    %116 = arith.addf %109, %115 : vector<4x256xf32>
    %c241_i32_83 = arith.constant 241 : i32
    %117 = tpu.dynamic_rotate %78 by %c241_i32_83 dim 1 : vector<4x256xf32>, i32 -> vector<4x256xf32>
    %118 = vector.broadcast %13 : vector<1x256xf32> to vector<4x256xf32>
    %119 = arith.mulf %117, %118 : vector<4x256xf32>
    %c6_84 = arith.constant 6 : index
    %c0_85 = arith.constant 0 : index
    %c0_86 = arith.constant 0 : index
    %120 = vector.load %arg3[%c6_84, %c0_85, %c0_86] : memref<9x4x4xf32, #tpu.memory_space<vmem>>, vector<1x4x4xf32>
    %121 = vector.shape_cast %120 : vector<1x4x4xf32> to vector<4x4xf32>
    %cst_87 = arith.constant dense<0.000000e+00> : vector<4x256xf32>
    %122 = tpu.matmul %121, %119, %cst_87 {dimension_numbers = #tpu.dot_dimension_numbers<[1], [0], [0], [1], [0, 0, 1, 1], [], []>} : vector<4x4xf32>, vector<4x256xf32>, vector<4x256xf32> -> vector<4x256xf32>
    %123 = arith.addf %116, %122 : vector<4x256xf32>
    %c240_i32_88 = arith.constant 240 : i32
    %124 = tpu.dynamic_rotate %78 by %c240_i32_88 dim 1 : vector<4x256xf32>, i32 -> vector<4x256xf32>
    %125 = vector.broadcast %15 : vector<1x256xf32> to vector<4x256xf32>
    %126 = arith.mulf %124, %125 : vector<4x256xf32>
    %c7_89 = arith.constant 7 : index
    %c0_90 = arith.constant 0 : index
    %c0_91 = arith.constant 0 : index
    %127 = vector.load %arg3[%c7_89, %c0_90, %c0_91] : memref<9x4x4xf32, #tpu.memory_space<vmem>>, vector<1x4x4xf32>
    %128 = vector.shape_cast %127 : vector<1x4x4xf32> to vector<4x4xf32>
    %cst_92 = arith.constant dense<0.000000e+00> : vector<4x256xf32>
    %129 = tpu.matmul %128, %126, %cst_92 {dimension_numbers = #tpu.dot_dimension_numbers<[1], [0], [0], [1], [0, 0, 1, 1], [], []>} : vector<4x4xf32>, vector<4x256xf32>, vector<4x256xf32> -> vector<4x256xf32>
    %130 = arith.addf %123, %129 : vector<4x256xf32>
    %c239_i32_93 = arith.constant 239 : i32
    %131 = tpu.dynamic_rotate %78 by %c239_i32_93 dim 1 : vector<4x256xf32>, i32 -> vector<4x256xf32>
    %132 = vector.broadcast %17 : vector<1x256xf32> to vector<4x256xf32>
    %133 = arith.mulf %131, %132 : vector<4x256xf32>
    %c8_94 = arith.constant 8 : index
    %c0_95 = arith.constant 0 : index
    %c0_96 = arith.constant 0 : index
    %134 = vector.load %arg3[%c8_94, %c0_95, %c0_96] : memref<9x4x4xf32, #tpu.memory_space<vmem>>, vector<1x4x4xf32>
    %135 = vector.shape_cast %134 : vector<1x4x4xf32> to vector<4x4xf32>
    %cst_97 = arith.constant dense<0.000000e+00> : vector<4x256xf32>
    %136 = tpu.matmul %135, %133, %cst_97 {dimension_numbers = #tpu.dot_dimension_numbers<[1], [0], [0], [1], [0, 0, 1, 1], [], []>} : vector<4x4xf32>, vector<4x256xf32>, vector<4x256xf32> -> vector<4x256xf32>
    %137 = arith.addf %130, %136 : vector<4x256xf32>
    %138 = arith.addf %137, %1 : vector<4x256xf32>
    %c0_98 = arith.constant 0 : index
    %c0_99 = arith.constant 0 : index
    %c0_100 = arith.constant 0 : index
    %139 = vector.load %arg5[%c0_98, %c0_99, %c0_100] : memref<1x4x256xf32, #tpu.memory_space<vmem>>, vector<1x4x256xf32>
    %140 = vector.shape_cast %139 : vector<1x4x256xf32> to vector<4x256xf32>
    %141 = vector.shape_cast %138 : vector<4x256xf32> to vector<1x4x256xf32>
    tpu.vector_store %arg5[%c0_98, %c0_99, %c0_100], %141 {strides = array<i32>} : memref<1x4x256xf32, #tpu.memory_space<vmem>>, vector<1x4x256xf32>,
    return
  }
  func.func @transform_0(%arg0: i32) -> (i32, i32, i32) {
    %c0_i32 = arith.constant 0 : i32
    %c0_i32_0 = arith.constant 0 : i32
    %c0_i32_1 = arith.constant 0 : i32
    return %arg0, %c0_i32, %c0_i32_0 : i32, i32, i32
  }
  func.func @transform_1(%arg0: i32) -> (i32, i32, i32) {
    %c0_i32 = arith.constant 0 : i32
    %c0_i32_0 = arith.constant 0 : i32
    %c0_i32_1 = arith.constant 0 : i32
    %c0_i32_2 = arith.constant 0 : i32
    return %c0_i32, %c0_i32_0, %c0_i32_1 : i32, i32, i32
  }
  func.func @transform_2(%arg0: i32) -> (i32, i32, i32) {
    %c0_i32 = arith.constant 0 : i32
    %c0_i32_0 = arith.constant 0 : i32
    %c0_i32_1 = arith.constant 0 : i32
    %c0_i32_2 = arith.constant 0 : i32
    return %c0_i32, %c0_i32_0, %c0_i32_1 : i32, i32, i32
  }
  func.func @transform_3(%arg0: i32) -> (i32, i32, i32) {
    %c0_i32 = arith.constant 0 : i32
    %c0_i32_0 = arith.constant 0 : i32
    %c0_i32_1 = arith.constant 0 : i32
    %c0_i32_2 = arith.constant 0 : i32
    return %c0_i32, %c0_i32_0, %c0_i32_1 : i32, i32, i32
  }
  func.func @transform_4(%arg0: i32) -> (i32, i32, i32) {
    %c0_i32 = arith.constant 0 : i32
    %c0_i32_0 = arith.constant 0 : i32
    %c0_i32_1 = arith.constant 0 : i32
    return %arg0, %c0_i32, %c0_i32_0 : i32, i32, i32
  }
}

</mosaic_0001>

<bundles_post_ra>
// kernel: tpu_custom_call.1
= control target key start
LH: loop header
LB: loop body
LE: loop exit
PB: predicated region body
PF: predicated region fallthrough
CT: control target
= control target key end

     0   :  { %9 = vsyncpa [#allocation3], 0  ;;  %s2166_s0 = inlined_call_operand.vmem [shape: f32[2,4,256], index: 0, kind: input, shape index: {}]   ;;  %s2167_s1 = inlined_call_operand.vmem [shape: f32[9,4,4], index: 1, kind: input, shape index: {}]   ;;  %s2168_s2 = inlined_call_operand.vmem [shape: f32[9,4,4], index: 2, kind: input, shape index: {}]   ;;  %s2169_s3 = inlined_call_operand.vmem [shape: f32[9,1,256], index: 3, kind: input, shape index: {}]   ;;  %s2170_s4 = inlined_call_operand.hbm [shape: f32[2,4,256], index: 4, kind: output, shape index: {}]  }
   0x1   :  { %11 = vsyncpa [#allocation3 + $0x1], 0  ;;  %s1722_s15 = smov 0   ;;  %s1724_s16 = smov 0  }
   0x2   :  { %s1726_s17 = smov 0   ;;  %s1728_s18 = smov 0  }
   0x3 LB: > { %s1743_s19 = sadd.s32 4294967295, %s1687_s18   ;;  %s1469_s20 = sadd.s32 4294967294, %s1687_s18   ;;  %s1687_s18 = sphi %s1728_s18, %s2176_s18   ;;  %s1683_s17 = sphi %s1726_s17, %s2175_s17   ;;  %s1679_s16 = sphi %s1724_s16, %s2174_s16   ;;  %s1675_s15 = sphi %s1722_s15, %s2173_s15  }
   0x4   : > { %s1747_s21 = sadd.s32 1, %s1687_s18   ;;  %s113_s22 = sadd.s32 1, %s1683_s17 }
   0x5   : > { %s110_s23 = ssub.s32 %s1687_s18, %s1747_s21  ;;  %p123_p0 = scmp.ne.s32.totalorder %s1683_s17, %s1679_s16 }
   0x6   : > { %p111_p1 = scmp.eq.s32.totalorder %s110_s23, 0  ;;  %p124_p2 = scmp.eq.s32.totalorder %s1743_s19, 1 }
   0x7   : > { %p129_p3 = scmp.ne.s32.totalorder %s1679_s16, %s1675_s15  ;;  %p130_p4 = scmp.eq.s32.totalorder %s1469_s20, 1 }
   0x8   : > { %s1758_s24 = scalar_select %p111_p1, %s1683_s17, %s113_s22  }
   0x9   : > { %p1760_p5 = por %p124_p2, %p123_p0  ;;  %p1764_p6 = por %p130_p4, %p129_p3 }
   0xa   : > { %p1472_p7 = scmp.ge.s32.totalorder %s1687_s18, 1  ;;  %p165_p8 = scmp.lt.s32.totalorder %s1687_s18, 3 }
   0xc   : > { %p166_p9 = pnand %p1472_p7, %p165_p8 }
   0xd   : > { %p191_p10 = scmp.lt.s32.totalorder (!%p166_p9), %s1743_s19, 1  ;;  %s1689_s6 = smov (!%p166_p9), 17  }
   0xe   : > { %169 = sbr.rel (%p166_p9) target bundleno = 643 (0x283), region = 36  ;;  %s1690_s7 = smov (!%p166_p9), 16  }
   0xf   : > { %s1691_s8 = smov (!%p166_p9), 15   ;;  %s1692_s9 = smov (!%p166_p9), 1  }
  0x10   : > { %s1693_s10 = smov (!%p166_p9), 127   ;;  %s1694_s11 = smov (!%p166_p9), 113  }
  0x11   : > { %s1695_s12 = smov (!%p166_p9), 112   ;;  %s1696_s13 = smov (!%p166_p9), 111  }
  0x13   : > { %s192_s27 = scalar_select %p191_p10, %s1743_s19, 1  ;;  %v222_v19 = vlaneseq  ;;  %v1800_v23 = vld [vmem:[%s2169_s3] sm:$0x3]  ;;  %vm260_vm1 = vcmask 1043456   ;;  %vm256_vm2 = vcmask 31744  }
  0x14   : > { %v228_v24 = vperm.slane %v1800_v23, 0  ;;  %v229_v25 = vperm.slane %v1800_v23, 1  ;;  %v234_v31 = vld [vmem:[%s2167_s1] sm:$0xf]  ;;  %v1824_v34 = vld [vmem:[%s2169_s3 + $0x4] sm:$0x3] }
  0x15   : > { %s1576_s28 = sshll.u32 %s192_s27, 3  ;;  %v1795_v21 = vand.u32 127, %v222_v19  ;;  %v1819_v33 = vld [vmem:[%s2169_s3 + $0x2] sm:$0x3]  ;;  %v369_v38 = vperm.slane %v1824_v34, 0  ;;  %v370_v39 = vperm.slane %v1824_v34, 1 }
  0x16   : > { %s195_s5 = scalar_lea.vmem %s2166_s0, %s1576_s28  ;;  %v248_v36 = vperm.slane %v1819_v33, 0  ;;  %v249_v37 = vperm.slane %v1819_v33, 1  ;;  %v1483_v46 = vld [vmem:[%s2167_s1 + $0x4] sm:$0xf]  ;;  %v1492_v59 = vld [vmem:[%s2167_s1 + $0x8] sm:$0xf] }
  0x17   : > { %v196_v0 = vld [vmem:[%s195_s5] sm:$0xff]  ;;  %vm224_vm0 = vcmp.lt.s32.totalorder %v1795_v21, 17  ;;  %vm365_vm3 = vcmp.lt.s32.totalorder %v1795_v21, 15  ;;  %vm244_vm4 = vcmp.lt.s32.totalorder %v1795_v21, 16  ;;  %vm437_vm5 = vcmp.lt.s32.totalorder %v1795_v21, 1  ;;  %s1645_s27 = scalar_lea.hbm %s2170_s4, 16 }
  0x18   : > { %213 = vst [vmem:[#allocation1] ss:$2 sm:$0xff] %v196_v0  ;;  %v1858_v50 = vld [vmem:[%s2169_s3 + $0x6] sm:$0x3]  ;;  %v1497_v60 = vld [vmem:[%s2167_s1 + $0xc] sm:$0xf] }
  0x19   : > { %v441_v51 = vperm.slane %v1858_v50, 0  ;;  %v442_v52 = vperm.slane %v1858_v50, 1  ;;  %v1502_v61 = vld [vmem:[%s2167_s1 + $0x10] sm:$0xf]  ;;  %v1899_v62 = vld [vmem:[%s2169_s3 + $0xa] sm:$0x3] }
  0x1a   : > { %vm563_vm6 = vcmp.lt.s32.totalorder %v1795_v21, 127  ;;  %vm635_vm7 = vcmp.lt.s32.totalorder %v1795_v21, 113  ;;  %vm707_vm8 = vcmp.lt.s32.totalorder %v1795_v21, 112  ;;  %vm779_vm9 = vcmp.lt.s32.totalorder %v1795_v21, 111 }
  0x1f   : > { %v214_v1 = vld.sshfl [vmem:[#allocation1] sm:$0xff pattern:$0x75316420]  ;;  %v215_v2 = vld.sshfl [vmem:[#allocation1 + $0x8] sm:$0xff pattern:$0x75316420] }
  0x20   : > { %218 = vrot.lane.b32.xlu0 %v214_v1, %s1689_s6  ;;  %235 = vst [vmem:[#allocation1] ss:$2 sm:$0xff] %v196_v0  ;;  %v568_v1 = vperm.slane %v1899_v62, 1 }
  0x27   : > { %v236_v3 = vld.sshfl [vmem:[#allocation1] sm:$0xff pattern:$0x75316420]  ;;  %v237_v4 = vld.sshfl [vmem:[#allocation1 + $0x8] sm:$0xff pattern:$0x75316420] }
  0x28   : > { %240 = vrot.lane.b32.xlu1 %v236_v3, %s1690_s7  ;;  %220 = vrot.lane.b32.xlu0 %v215_v2, %s1689_s6  ;;  %356 = vst [vmem:[#allocation1] ss:$2 sm:$0xff] %v196_v0 }
  0x2f   : > { %v357_v5 = vld.sshfl [vmem:[#allocation1] sm:$0xff pattern:$0x75316420]  ;;  %v358_v6 = vld.sshfl [vmem:[#allocation1 + $0x8] sm:$0xff pattern:$0x75316420] }
  0x30   : > { %242 = vrot.lane.b32.xlu1 %v237_v4, %s1690_s7  ;;  %428 = vst [vmem:[#allocation1] ss:$2 sm:$0xff] %v196_v0  ;;  %361 = vrot.lane.b32.xlu2 %v357_v5, %s1691_s8 }
  0x37   : > { %v430_v7 = vld.sshfl [vmem:[#allocation1 + $0x8] sm:$0xff pattern:$0x75316420]  ;;  %v429_v8 = vld.sshfl [vmem:[#allocation1] sm:$0xff pattern:$0x75316420] }
  0x38   : > { %435 = vrot.lane.b32.xlu1 %v430_v7, %s1692_s9  ;;  %433 = vrot.lane.b32.xlu0 %v429_v8, %s1692_s9  ;;  %502 = vst [vmem:[#allocation1] ss:$2 sm:$0xff] %v196_v0  ;;  %v1507_v7 = vld [vmem:[%s2167_s1 + $0x14] sm:$0xf]  ;;  %v1920_v8 = vld [vmem:[%s2169_s3 + $0xc] sm:$0x3] }
  0x39   : > { %363 = vrot.lane.b32.xlu2 %v358_v6, %s1691_s8 }
  0x3f   : > { %v1783_v9 = vld.sshfl [vmem:[#allocation1] sm:$0xff pattern:$0x75316420]  ;;  %v1785_v10 = vld.sshfl [vmem:[#allocation1 + $0x8] sm:$0xff pattern:$0x75316420] }
  0x40   : > { %554 = vst [vmem:[#allocation1] ss:$2 sm:$0xff] %v196_v0 }
  0x47   : > { %v556_v11 = vld.sshfl [vmem:[#allocation1 + $0x8] sm:$0xff pattern:$0x75316420]  ;;  %v555_v12 = vld.sshfl [vmem:[#allocation1] sm:$0xff pattern:$0x75316420] }
  0x48   : > { %561 = vrot.lane.b32.xlu0 %v556_v11, %s1693_s10  ;;  %626 = vst [vmem:[#allocation1] ss:$2 sm:$0xff] %v196_v0  ;;  %559 = vrot.lane.b32.xlu2 %v555_v12, %s1693_s10  ;;  %v640_v11 = vperm.slane %v1920_v8, 1 }
  0x4f   : > { %v627_v13 = vld.sshfl [vmem:[#allocation1] sm:$0xff pattern:$0x75316420]  ;;  %v628_v14 = vld.sshfl [vmem:[#allocation1 + $0x8] sm:$0xff pattern:$0x75316420] }
  0x50   : > { %631 = vrot.lane.b32.xlu1 %v627_v13, %s1694_s11  ;;  %698 = vst [vmem:[#allocation1] ss:$2 sm:$0xff] %v196_v0  ;;  %633 = vrot.lane.b32.xlu2 %v628_v14, %s1694_s11 }
  0x57   : > { %v700_v15 = vld.sshfl [vmem:[#allocation1 + $0x8] sm:$0xff pattern:$0x75316420]  ;;  %v699_v16 = vld.sshfl [vmem:[#allocation1] sm:$0xff pattern:$0x75316420] }
  0x58   : > { %705 = vrot.lane.b32.xlu1 %v700_v15, %s1695_s12  ;;  %703 = vrot.lane.b32.xlu0 %v699_v16, %s1695_s12  ;;  %770 = vst [vmem:[#allocation1] ss:$2 sm:$0xff] %v196_v0 }
  0x5f   : > { %v772_v17 = vld.sshfl [vmem:[#allocation1 + $0x8] sm:$0xff pattern:$0x75316420]  ;;  %v771_v18 = vld.sshfl [vmem:[#allocation1] sm:$0xff pattern:$0x75316420] }
  0x60   : > { %777 = vrot.lane.b32.xlu0 %v772_v17, %s1696_s13  ;;  %775 = vrot.lane.b32.xlu2 %v771_v18, %s1696_s13  ;;  %1380 = vst [vmem:[#allocation1] ss:$2 sm:$0xff] %v196_v0  ;;  %v567_v0 = vperm.slane %v1899_v62, 0  ;;  %v1512_v17 = vld [vmem:[%s2167_s1 + $0x18] sm:$0xf] }
  0x61   : > { %v1943_v18 = vld [vmem:[%s2169_s3 + $0xe] sm:$0x3]  ;;  %v1551_v62 = vld [vmem:[%s2168_s2 + $0x14] sm:$0xf] }
  0x62   : > { %v711_v19 = vperm.slane %v1943_v18, 0 }
  0x8a   : > { %v362_v22 = vpop.permute.xlu2 %361 }
  0x92   : > { %v219_v20 = vpop.permute.xlu0 %218 }
  0x93   : > { %v364_v35 = vpop.permute.xlu2 %363 }
  0x94   : > { %v366_v40 = vsel %vm365_vm3, %v362_v22, %v364_v35  ;;  %v367_v41 = vsel %vm365_vm3, %v364_v35, %v362_v22 }
  0x95   : > { %v373_v48 = vmul.f32 %v369_v38, %v367_v41  ;;  %v374_v49 = vmul.f32 %v370_v39, %v366_v40 }
  0x9a   : > { %v241_v26 = vpop.permute.xlu1 %240  ;;  %v221_v27 = vpop.permute.xlu0 %220 }
  0x9b   : > { %v225_v28 = vsel %vm224_vm0, %v219_v20, %v221_v27  ;;  %v226_v29 = vsel %vm224_vm0, %v221_v27, %v219_v20  ;;  %v712_v20 = vperm.slane %v1943_v18, 1 }
  0x9c   : > { %v232_v30 = vmul.f32 %v228_v24, %v226_v29  ;;  %v233_v32 = vmul.f32 %v229_v25, %v225_v28 }
  0x9e   : > { %1488 = vmatpush.msk.msra.mxu2 %vm260_vm1, %v232_v30  ;;  %1490 = vmatpush.msk.msra.mxu3 %vm260_vm1, %v233_v32  ;;  %v1966_v32 = vld [vmem:[%s2169_s3 + $0x10] sm:$0x3] }
  0x9f   : > { %1489 = vmatmul.msk.f32.vlgmr.msra.gmra.mxu2 %vm256_vm2, %v234_v31  ;;  %1491 = vmatmul.msk.f32.vlgmr.msra.gmra.mxu3 %vm256_vm2, %v234_v31  ;;  %v1517_v31 = vld [vmem:[%s2167_s1 + $0x1c] sm:$0xf]  ;;  %v783_v35 = vperm.slane %v1966_v32, 0  ;;  %v784_v40 = vperm.slane %v1966_v32, 1 }
  0xa2   : > { %v243_v42 = vpop.permute.xlu1 %242  ;;  %v560_v63 = vpop.permute.xlu2 %559 }
  0xa3   : > { %v245_v43 = vsel %vm244_vm4, %v241_v26, %v243_v42  ;;  %v246_v44 = vsel %vm244_vm4, %v243_v42, %v241_v26 }
  0xa4   : > { %v252_v45 = vmul.f32 %v248_v36, %v246_v44  ;;  %v253_v47 = vmul.f32 %v249_v37, %v245_v43 }
  0xa6   : > { %1484 = vmatpush.msk.msra.mxu0 %vm260_vm1, %v252_v45  ;;  %1486 = vmatpush.msk.msra.mxu1 %vm260_vm1, %v253_v47  ;;  %v1522_v47 = vld [vmem:[%s2167_s1 + $0x20] sm:$0xf] }
  0xa7   : > { %1485 = vmatmul.msk.f32.vlgmr.msra.gmra.mxu0 %vm256_vm2, %v1483_v46  ;;  %1487 = vmatmul.msk.f32.vlgmr.msra.gmra.mxu1 %vm256_vm2, %v1483_v46 }
  0xa8   : > { %1493 = vmatpush.msk.msrb.mxu0 %vm260_vm1, %v373_v48  ;;  %1495 = vmatpush.msk.msrb.mxu1 %vm260_vm1, %v374_v49 }
  0xaa   : > { %1503 = vmatpush.msk.msra.mxu0 %vm260_vm1, %v1783_v9  ;;  %1505 = vmatpush.msk.msra.mxu1 %vm260_vm1, %v1785_v10  ;;  %v436_v53 = vpop.permute.xlu1 %435  ;;  %v434_v54 = vpop.permute.xlu0 %433  ;;  %v639_v10 = vperm.slane %v1920_v8, 0 }
  0xab   : > { %v438_v55 = vsel %vm437_vm5, %v434_v54, %v436_v53  ;;  %v439_v56 = vsel %vm437_vm5, %v436_v53, %v434_v54  ;;  %v634_v9 = vpop.permute.xlu2 %633 }
  0xac   : > { %v445_v57 = vmul.f32 %v441_v51, %v439_v56  ;;  %v446_v58 = vmul.f32 %v442_v52, %v438_v55 }
  0xae   : > { %1498 = vmatpush.msk.msrb.mxu2 %vm260_vm1, %v445_v57  ;;  %1500 = vmatpush.msk.msrb.mxu3 %vm260_vm1, %v446_v58 }
  0xaf   : > { %1494 = vmatmul.msk.f32.vlgmr.msrb.gmra.mxu0 %vm256_vm2, %v1492_v59  ;;  %1499 = vmatmul.msk.f32.vlgmr.msrb.gmra.mxu2 %vm256_vm2, %v1497_v60 }
  0xb0   : > { %1496 = vmatmul.msk.f32.vlgmr.msrb.gmra.mxu1 %vm256_vm2, %v1492_v59  ;;  %1501 = vmatmul.msk.f32.vlgmr.msrb.gmra.mxu3 %vm256_vm2, %v1497_v60 }
  0xb7   : > { %1504 = vmatmul.msk.f32.vlgmr.msra.gmra.mxu0 %vm256_vm2, %v1502_v61 }
  0xb8   : > { %1506 = vmatmul.msk.f32.vlgmr.msra.gmra.mxu1 %vm256_vm2, %v1502_v61 }
  0xba   : > { %v562_v2 = vpop.permute.xlu0 %561  ;;  %v776_v41 = vpop.permute.xlu2 %775 }
  0xbb   : > { %v564_v3 = vsel %vm563_vm6, %v560_v63, %v562_v2  ;;  %v565_v4 = vsel %vm563_vm6, %v562_v2, %v560_v63 }
  0xbc   : > { %v571_v5 = vmul.f32 %v567_v0, %v564_v3  ;;  %v572_v6 = vmul.f32 %v568_v1, %v565_v4 }
  0xbe   : > { %1508 = vmatpush.msk.msra.mxu2 %vm260_vm1, %v571_v5  ;;  %1510 = vmatpush.msk.msra.mxu3 %vm260_vm1, %v572_v6 }
  0xbf   : > { %1509 = vmatmul.msk.f32.vlgmr.msra.gmra.mxu2 %vm256_vm2, %v1507_v7  ;;  %1511 = vmatmul.msk.f32.vlgmr.msra.gmra.mxu3 %vm256_vm2, %v1507_v7 }
  0xc2   : > { %v632_v12 = vpop.permute.xlu1 %631 }
  0xc3   : > { %v636_v13 = vsel %vm635_vm7, %v632_v12, %v634_v9  ;;  %v637_v14 = vsel %vm635_vm7, %v634_v9, %v632_v12 }
  0xc4   : > { %v643_v15 = vmul.f32 %v639_v10, %v636_v13  ;;  %v644_v16 = vmul.f32 %v640_v11, %v637_v14 }
  0xc6   : > { %1513 = vmatpush.msk.msrb.mxu0 %vm260_vm1, %v643_v15  ;;  %1515 = vmatpush.msk.msrb.mxu1 %vm260_vm1, %v644_v16 }
  0xc7   : > { %1514 = vmatmul.msk.f32.vlgmr.msrb.gmra.mxu0 %vm256_vm2, %v1512_v17  ;;  %1516 = vmatmul.msk.f32.vlgmr.msrb.gmra.mxu1 %vm256_vm2, %v1512_v17 }
  0xca   : > { %v706_v22 = vpop.permute.xlu1 %705  ;;  %v704_v26 = vpop.permute.xlu0 %703 }
  0xcb   : > { %v708_v27 = vsel %vm707_vm8, %v704_v26, %v706_v22  ;;  %v709_v28 = vsel %vm707_vm8, %v706_v22, %v704_v26 }
  0xcc   : > { %v715_v29 = vmul.f32 %v711_v19, %v708_v27  ;;  %v716_v30 = vmul.f32 %v712_v20, %v709_v28 }
  0xce   : > { %1518 = vmatpush.msk.msrb.mxu2 %vm260_vm1, %v715_v29  ;;  %1520 = vmatpush.msk.msrb.mxu3 %vm260_vm1, %v716_v30 }
  0xcf   : > { %1519 = vmatmul.msk.f32.vlgmr.msrb.gmra.mxu2 %vm256_vm2, %v1517_v31  ;;  %1521 = vmatmul.msk.f32.vlgmr.msrb.gmra.mxu3 %vm256_vm2, %v1517_v31 }
  0xd2   : > { %v778_v42 = vpop.permute.xlu0 %777 }
  0xd3   : > { %v780_v43 = vsel %vm779_vm9, %v776_v41, %v778_v42  ;;  %v781_v44 = vsel %vm779_vm9, %v778_v42, %v776_v41 }
  0xd4   : > { %v787_v45 = vmul.f32 %v783_v35, %v780_v43  ;;  %v788_v46 = vmul.f32 %v784_v40, %v781_v44 }
  0xd6   : > { %1523 = vmatpush.msk.msra.mxu0 %vm260_vm1, %v787_v45  ;;  %1525 = vmatpush.msk.msra.mxu1 %vm260_vm1, %v788_v46 }
  0xd7   : > { %1524 = vmatmul.msk.f32.vlgmr.msra.gmra.mxu0 %vm256_vm2, %v1522_v47  ;;  %1526 = vmatmul.msk.f32.vlgmr.msra.gmra.mxu1 %vm256_vm2, %v1522_v47 }
 0x122   : > { %v353_v53 = vpop.f32.mrf.mxu3  ;;  %v333_v54 = vpop.f32.mrf.mxu2 }
 0x124   : > { %v304_v48 = vpop.f32.mrf.mxu1  ;;  %v284_v49 = vpop.f32.mrf.mxu0 }
 0x125   : > { %v354_v57 = vadd.f32 %v353_v53, %v304_v48  ;;  %v334_v58 = vadd.f32 %v333_v54, %v284_v49 }
 0x12c   : > { %v403_v56 = vpop.f32.mrf.mxu0 }
 0x12d   : > { %v423_v55 = vpop.f32.mrf.mxu1  ;;  %v426_v2 = vadd.f32 %v403_v56, %v334_v58  ;;  %v1527_v56 = vld [vmem:[%s2168_s2 + $0x4] sm:$0xf] }
 0x12e   : > { %v427_v60 = vadd.f32 %v423_v55, %v354_v57 }
 0x132   : > { %v475_v61 = vpop.f32.mrf.mxu2 }
 0x133   : > { %v495_v59 = vpop.f32.mrf.mxu3  ;;  %v498_v5 = vadd.f32 %v475_v61, %v426_v2 }
 0x134   : > { %v529_v3 = vpop.f32.mrf.mxu0  ;;  %v499_v4 = vadd.f32 %v495_v59, %v427_v60 }
 0x135   : > { %v549_v63 = vpop.f32.mrf.mxu1  ;;  %v552_v12 = vadd.f32 %v529_v3, %v498_v5  ;;  %v1536_v3 = vld [vmem:[%s2168_s2 + $0x8] sm:$0xf] }
 0x136   : > { %v553_v6 = vadd.f32 %v549_v63, %v499_v4 }
 0x142   : > { %v601_v7 = vpop.f32.mrf.mxu2  ;;  %v621_v9 = vpop.f32.mrf.mxu3 }
 0x143   : > { %v624_v15 = vadd.f32 %v601_v7, %v552_v12  ;;  %v625_v16 = vadd.f32 %v621_v9, %v553_v6  ;;  %v1546_v6 = vld [vmem:[%s2168_s2 + $0x10] sm:$0xf]  ;;  %v1541_v7 = vld [vmem:[%s2168_s2 + $0xc] sm:$0xf] }
 0x144   : > { %v673_v13 = vpop.f32.mrf.mxu0  ;;  %v693_v14 = vpop.f32.mrf.mxu1 }
 0x145   : > { %v696_v17 = vadd.f32 %v673_v13, %v624_v15  ;;  %v697_v22 = vadd.f32 %v693_v14, %v625_v16 }
 0x152   : > { %v745_v26 = vpop.f32.mrf.mxu2  ;;  %v765_v27 = vpop.f32.mrf.mxu3 }
 0x153   : > { %v768_v28 = vadd.f32 %v745_v26, %v696_v17  ;;  %v769_v29 = vadd.f32 %v765_v27, %v697_v22  ;;  %v1556_v26 = vld [vmem:[%s2168_s2 + $0x18] sm:$0xf] }
 0x154   : > { %v817_v30 = vpop.f32.mrf.mxu0  ;;  %v837_v31 = vpop.f32.mrf.mxu1 }
 0x155   : > { %v840_v41 = vadd.f32 %v817_v30, %v768_v28  ;;  %v841_v42 = vadd.f32 %v837_v31, %v769_v29  ;;  %v1566_v28 = vld [vmem:[%s2168_s2 + $0x20] sm:$0xf] }
 0x157   : > { %v842_v43 = vmax.f32 %v840_v41, 0.0  ;;  %v843_v44 = vmax.f32 %v841_v42, 0.0  ;;  %v1561_v41 = vld [vmem:[%s2168_s2 + $0x1c] sm:$0xf] }
 0x159   : > { %855 = vrot.lane.b32.xlu2 %v843_v44, %s1690_s7  ;;  %961 = vrot.lane.b32.xlu0 %v842_v43, %s1691_s8 }
 0x15a   : > { %853 = vrot.lane.b32.xlu1 %v842_v43, %s1690_s7  ;;  %s188_s7 = sand.u32 1, %s1679_s16  }
 0x161   : > { %844 = vrot.lane.b32.xlu2 %v842_v43, %s1689_s6  ;;  %846 = vrot.lane.b32.xlu0 %v843_v44, %s1689_s6 }
 0x162   : > { %963 = vrot.lane.b32.xlu1 %v843_v44, %s1691_s8  ;;  %s1473_s8 = sshll.u32 %s188_s7, 3 }
 0x169   : > { %1024 = vrot.lane.b32.xlu2 %v843_v44, %s1692_s9  ;;  %1197 = vrot.lane.b32.xlu0 %v842_v43, %s1694_s11 }
 0x16a   : > { %1022 = vrot.lane.b32.xlu1 %v842_v43, %s1692_s9  ;;  %s1577_s9 = sshll.u32 %s1743_s19, 3  ;;  %s1394_s19 = scalar_lea.sflag [#allocation3], %s188_s7 }
 0x171   : > { %1136 = vrot.lane.b32.xlu2 %v842_v43, %s1693_s10  ;;  %1138 = vrot.lane.b32.xlu0 %v843_v44, %s1693_s10 }
 0x172   : > { %1199 = vrot.lane.b32.xlu1 %v843_v44, %s1694_s11 }
 0x179   : > { %1321 = vrot.lane.b32.xlu2 %v843_v44, %s1696_s13  ;;  %1258 = vrot.lane.b32.xlu0 %v842_v43, %s1695_s12 }
 0x17a   : > { %1319 = vrot.lane.b32.xlu1 %v842_v43, %s1696_s13  ;;  %s190_s13 = scalar_lea.vmem [#allocation2], %s1473_s8 }
 0x17b   : > { %s1407_s30 = sshll.u32 %s190_s13, 4  ;;  %s1408_s30 = int_to_ptr.vmem [resolvable:$true] %s1407_s30 }
 0x182   : > { %1260 = vrot.lane.b32.xlu1 %v843_v44, %s1695_s12  ;;  %s1405_s12 = scalar_lea.hbm %s2170_s4, %s1577_s9 }
 0x183   : > { %s1409_s5 = sshll.u32 %s1405_s12, 4  ;;  %s1410_s5 = int_to_ptr.hbm [resolvable:$true] %s1409_s5 }
 0x184   : > { %s1639_s14 = sshra.s32 %s1410_s5, 4  ;;  %s1640_s14 = int_to_ptr.hbm [resolvable:$true] %s1639_s14 }
 0x185   : > { %s1641_s20 = scalar_lea.hbm %s1640_s14, 8  ;;  %p1646_p0 = scmp.lt.s32.totalorder %s1640_s14, %s2170_s4 }
 0x186   : > { %p1642_p11 = scmp.ne.s32.totalorder %s1640_s14, %s1641_s20  ;;  %p1647_p1 = scmp.lt.s32.totalorder %s1645_s27, %s1641_s20 }
 0x188   : > { %p1643_p12 = pnand %p1642_p11, %p1760_p5  ;;  %p1648_p2 = por %p1647_p1, %p1646_p0 }
 0x18a   : > { %p1644_p13 = pneg %p1643_p12 }
 0x18c   : > { %p1649_p3 = pnand %p1648_p2, %p1644_p13 }
 0x1b3   : > { %v856_v45 = vpop.permute.xlu2 %855 }
 0x1bb   : > { %v845_v53 = vpop.permute.xlu2 %844 }
 0x1c3   : > { %v1025_v23 = vpop.permute.xlu2 %1024 }
 0x1cb   : > { %v962_v46 = vpop.permute.xlu0 %961 }
 0x1cc   : > { %v854_v47 = vpop.permute.xlu1 %853 }
 0x1cd   : > { %v857_v48 = vsel %vm244_vm4, %v854_v47, %v856_v45  ;;  %v858_v49 = vsel %vm244_vm4, %v856_v45, %v854_v47 }
 0x1ce   : > { %v859_v54 = vmul.f32 %v858_v49, %v248_v36  ;;  %v860_v55 = vmul.f32 %v857_v48, %v249_v37 }
 0x1d0   : > { %1528 = vmatpush.msk.msra.mxu2 %vm260_vm1, %v859_v54  ;;  %1530 = vmatpush.msk.msra.mxu3 %vm260_vm1, %v860_v55 }
 0x1d1   : > { %1529 = vmatmul.msk.f32.vlgmr.msra.gmra.mxu2 %vm256_vm2, %v1527_v56  ;;  %1531 = vmatmul.msk.f32.vlgmr.msra.gmra.mxu3 %vm256_vm2, %v1527_v56 }
 0x1d3   : > { %v847_v57 = vpop.permute.xlu0 %846 }
 0x1d4   : > { %v848_v58 = vsel %vm224_vm0, %v845_v53, %v847_v57  ;;  %v849_v33 = vsel %vm224_vm0, %v847_v57, %v845_v53  ;;  %v964_v36 = vpop.permute.xlu1 %963 }
 0x1d5   : > { %v850_v37 = vmul.f32 %v849_v33, %v228_v24  ;;  %v851_v59 = vmul.f32 %v848_v58, %v229_v25  ;;  %v965_v60 = vsel %vm365_vm3, %v962_v46, %v964_v36  ;;  %v966_v61 = vsel %vm365_vm3, %v964_v36, %v962_v46  ;;  %v852_v24 = vld [vmem:[%s2168_s2] sm:$0xf] }
 0x1d6   : > { %v967_v63 = vmul.f32 %v966_v61, %v369_v38  ;;  %v968_v2 = vmul.f32 %v965_v60, %v370_v39 }
 0x1d7   : > { %1532 = vmatpush.msk.msrb.mxu0 %vm260_vm1, %v850_v37  ;;  %1534 = vmatpush.msk.msrb.mxu1 %vm260_vm1, %v851_v59 }
 0x1d8   : > { %1537 = vmatpush.msk.msrb.mxu2 %vm260_vm1, %v967_v63  ;;  %1539 = vmatpush.msk.msrb.mxu3 %vm260_vm1, %v968_v2 }
 0x1d9   : > { %1538 = vmatmul.msk.f32.vlgmr.msrb.gmra.mxu2 %vm256_vm2, %v1536_v3  ;;  %1540 = vmatmul.msk.f32.vlgmr.msrb.gmra.mxu3 %vm256_vm2, %v1536_v3 }
 0x1da   : > { %1547 = vmatpush.msk.msra.mxu2 %vm260_vm1, %v842_v43  ;;  %1549 = vmatpush.msk.msra.mxu3 %vm260_vm1, %v843_v44 }
 0x1db   : > { %1535 = vmatmul.msk.f32.vlgmr.msrb.gmra.mxu1 %vm256_vm2, %v852_v24  ;;  %1533 = vmatmul.msk.f32.vlgmr.msrb.gmra.mxu0 %vm256_vm2, %v852_v24  ;;  %v1198_v25 = vpop.permute.xlu0 %1197 }
 0x1dc   : > { %v1023_v34 = vpop.permute.xlu1 %1022 }
 0x1dd   : > { %v1026_v38 = vsel %vm437_vm5, %v1023_v34, %v1025_v23  ;;  %v1027_v39 = vsel %vm437_vm5, %v1025_v23, %v1023_v34 }
 0x1de   : > { %v1028_v4 = vmul.f32 %v1027_v39, %v441_v51  ;;  %v1029_v5 = vmul.f32 %v1026_v38, %v442_v52  ;;  %v1137_v51 = vpop.permute.xlu2 %1136  ;;  %v1382_v39 = vld.sshfl [vmem:[#allocation1 + $0x8] sm:$0xff pattern:$0x75316420] }
 0x1e0   : > { %1542 = vmatpush.msk.msra.mxu0 %vm260_vm1, %v1028_v4  ;;  %1544 = vmatpush.msk.msra.mxu1 %vm260_vm1, %v1029_v5 }
 0x1e1   : > { %1548 = vmatmul.msk.f32.vlgmr.msra.gmra.mxu2 %vm256_vm2, %v1546_v6  ;;  %1550 = vmatmul.msk.f32.vlgmr.msra.gmra.mxu3 %vm256_vm2, %v1546_v6  ;;  %v1381_v6 = vld.sshfl [vmem:[#allocation1] sm:$0xff pattern:$0x75316420] }
 0x1e3   : > { %1545 = vmatmul.msk.f32.vlgmr.msra.gmra.mxu1 %vm256_vm2, %v1541_v7  ;;  %v1139_v50 = vpop.permute.xlu0 %1138  ;;  %1543 = vmatmul.msk.f32.vlgmr.msra.gmra.mxu0 %vm256_vm2, %v1541_v7 }
 0x1e4   : > { %v1140_v52 = vsel %vm563_vm6, %v1137_v51, %v1139_v50  ;;  %v1141_v9 = vsel %vm563_vm6, %v1139_v50, %v1137_v51  ;;  %v1200_v12 = vpop.permute.xlu1 %1199 }
 0x1e5   : > { %v1142_v13 = vmul.f32 %v1140_v52, %v567_v0  ;;  %v1143_v14 = vmul.f32 %v1141_v9, %v568_v1  ;;  %v1201_v15 = vsel %vm635_vm7, %v1198_v25, %v1200_v12  ;;  %v1202_v16 = vsel %vm635_vm7, %v1200_v12, %v1198_v25 }
 0x1e6   : > { %v1203_v17 = vmul.f32 %v1201_v15, %v639_v10  ;;  %v1204_v22 = vmul.f32 %v1202_v16, %v640_v11  ;;  %v1322_v0 = vpop.permute.xlu2 %1321 }
 0x1e7   : > { %1552 = vmatpush.msk.msrb.mxu0 %vm260_vm1, %v1142_v13  ;;  %1554 = vmatpush.msk.msrb.mxu1 %vm260_vm1, %v1143_v14 }
 0x1e8   : > { %1557 = vmatpush.msk.msrb.mxu2 %vm260_vm1, %v1203_v17  ;;  %1559 = vmatpush.msk.msrb.mxu3 %vm260_vm1, %v1204_v22 }
 0x1e9   : > { %1558 = vmatmul.msk.f32.vlgmr.msrb.gmra.mxu2 %vm256_vm2, %v1556_v26  ;;  %1560 = vmatmul.msk.f32.vlgmr.msrb.gmra.mxu3 %vm256_vm2, %v1556_v26 }
 0x1eb   : > { %1555 = vmatmul.msk.f32.vlgmr.msrb.gmra.mxu1 %vm256_vm2, %v1551_v62  ;;  %1553 = vmatmul.msk.f32.vlgmr.msrb.gmra.mxu0 %vm256_vm2, %v1551_v62  ;;  %v1259_v29 = vpop.permute.xlu0 %1258 }
 0x1ec   : > { %v1320_v1 = vpop.permute.xlu1 %1319 }
 0x1ed   : > { %v1323_v8 = vsel %vm779_vm9, %v1320_v1, %v1322_v0  ;;  %v1324_v10 = vsel %vm779_vm9, %v1322_v0, %v1320_v1 }
 0x1ee   : > { %v1325_v11 = vmul.f32 %v1323_v8, %v783_v35  ;;  %v1326_v27 = vmul.f32 %v1324_v10, %v784_v40 }
 0x1f0   : > { %1567 = vmatpush.msk.msra.mxu2 %vm260_vm1, %v1325_v11  ;;  %1569 = vmatpush.msk.msra.mxu3 %vm260_vm1, %v1326_v27 }
 0x1f1   : > { %1568 = vmatmul.msk.f32.vlgmr.msra.gmra.mxu2 %vm256_vm2, %v1566_v28  ;;  %1570 = vmatmul.msk.f32.vlgmr.msra.gmra.mxu3 %vm256_vm2, %v1566_v28 }
 0x1f4   : > { %v1261_v30 = vpop.permute.xlu1 %1260 }
 0x1f5   : > { %v1262_v35 = vsel %vm707_vm8, %v1259_v29, %v1261_v30  ;;  %v1263_v32 = vsel %vm707_vm8, %v1261_v30, %v1259_v29 }
 0x1f6   : > { %v1264_v40 = vmul.f32 %v1262_v35, %v711_v19  ;;  %v1265_v31 = vmul.f32 %v1263_v32, %v712_v20 }
 0x1f8   : > { %1562 = vmatpush.msk.msra.mxu0 %vm260_vm1, %v1264_v40  ;;  %1564 = vmatpush.msk.msra.mxu1 %vm260_vm1, %v1265_v31 }
 0x1f9   : > { %1563 = vmatmul.msk.f32.vlgmr.msra.gmra.mxu0 %vm256_vm2, %v1561_v41  ;;  %1565 = vmatmul.msk.f32.vlgmr.msra.gmra.mxu1 %vm256_vm2, %v1561_v41 }
 0x254   : > { %v889_v21 = vpop.f32.mrf.mxu2  ;;  %v909_v42 = vpop.f32.mrf.mxu3 }
 0x258   : > { %v958_v43 = vpop.f32.mrf.mxu1  ;;  %v938_v44 = vpop.f32.mrf.mxu0 }
 0x259   : > { %v939_v48 = vadd.f32 %v938_v44, %v889_v21  ;;  %v959_v49 = vadd.f32 %v958_v43, %v909_v42 }
 0x25c   : > { %v997_v19 = vpop.f32.mrf.mxu2  ;;  %v1017_v45 = vpop.f32.mrf.mxu3 }
 0x25d   : > { %v1020_v53 = vadd.f32 %v997_v19, %v939_v48  ;;  %v1021_v54 = vadd.f32 %v1017_v45, %v959_v49 }
 0x260   : > { %v1078_v18 = vpop.f32.mrf.mxu1  ;;  %v1058_v20 = vpop.f32.mrf.mxu0 }
 0x261   : > { %v1082_v55 = vadd.f32 %v1078_v18, %v1021_v54  ;;  %v1081_v56 = vadd.f32 %v1058_v20, %v1020_v53 }
 0x264   : > { %v1111_v46 = vpop.f32.mrf.mxu2  ;;  %v1131_v47 = vpop.f32.mrf.mxu3 }
 0x265   : > { %v1134_v37 = vadd.f32 %v1111_v46, %v1081_v56  ;;  %v1135_v59 = vadd.f32 %v1131_v47, %v1082_v55 }
 0x268   : > { %v1192_v33 = vpop.f32.mrf.mxu1  ;;  %v1172_v36 = vpop.f32.mrf.mxu0 }
 0x269   : > { %v1196_v60 = vadd.f32 %v1192_v33, %v1135_v59  ;;  %v1195_v61 = vadd.f32 %v1172_v36, %v1134_v37 }
 0x26c   : > { %v1233_v57 = vpop.f32.mrf.mxu2  ;;  %v1253_v58 = vpop.f32.mrf.mxu3 }
 0x26d   : > { %v1256_v63 = vadd.f32 %v1233_v57, %v1195_v61  ;;  %v1257_v2 = vadd.f32 %v1253_v58, %v1196_v60 }
 0x274   : > { %v1355_v3 = vpop.f32.mrf.mxu2  ;;  %v1375_v23 = vpop.f32.mrf.mxu3 }
 0x276   : > { %v1294_v24 = vpop.f32.mrf.mxu0  ;;  %v1314_v25 = vpop.f32.mrf.mxu1 }
 0x277   : > { %v1317_v34 = vadd.f32 %v1294_v24, %v1256_v63  ;;  %v1318_v38 = vadd.f32 %v1314_v25, %v1257_v2 }
 0x279   : > { %v1378_v4 = vadd.f32 %v1355_v3, %v1317_v34  ;;  %v1379_v5 = vadd.f32 %v1375_v23, %v1318_v38 }
 0x27b   : > { %v1386_v7 = vadd.f32 %v1382_v39, %v1379_v5  ;;  %v1385_v51 = vadd.f32 %v1381_v6, %v1378_v4 }
 0x27d   : > { %v1389_v50 = vrot.slane %v1386_v7, 4 }
 0x27f   : > { %v1390_v52 = vsel %vm260_vm1, %v1385_v51, %v1389_v50 }
 0x280   : > { %1392 = vst [vmem:[%s190_s13] sm:$0xff] %v1390_v52 }
 0x281   : > { %1652 = shalt.err (!%p1649_p3)
}
 0x282   : > { %1578 = dma.vmem_to_hbm [thread:$0]  (%p1760_p5), %s1408_s30, 128, %s1410_s5, %s1394_s19  }
 0x283 PF: > { %p1584_p4 = scmp.ge.s32.totalorder %s1687_s18, 2  ;;  %s1421_s6 = sand.u32 1, %s1675_s15  }
 0x284   : > { %s1422_s7 = scalar_lea.sflag [#allocation3], %s1421_s6 }
 0x285   : > { %p1581_p7 = pnand %p1584_p4, %p1764_p6 }
 0x287   : > { %p1582_p8 = pneg %p1581_p7 }
 0x289   : > { %1670 = dma.done.wait (%p1582_p8), %s1422_s7, 128  }
 0x28a   : > { %1672 = vsyncadd (%p1582_p8), %s1422_s7, 4294967168  ;;  %p14_p9 = scmp.ge.s32.totalorder %s1747_s21, 4   ;;  %s2173_s15 = smov %s1679_s16 }
 0x28b   : > { %s2174_s16 = smov %s1683_s17  ;;  %s2175_s17 = smov %s1758_s24 }
 0x28c   : > { %s2176_s18 = smov %s1747_s21  ;;  %16 = sbr.rel (!%p14_p9) target bundleno = 3 (0x3), region = 94 }
 0x291   :  { %1428 = vsyncpa [#allocation3], 1 }
 0x292   :  { %1430 = vsyncpa [#allocation3 + $0x1], 1 }

</bundles_post_ra>
